<compile_context>
chip_gen: v7x
topology: tpu7x:2x2x1
jax: 0.10.0
libtpu: 0.0.40
codegen_flags: <defaults>
</compile_context>

<pallas_src>
import functools

import jax
import jax.numpy as jnp
from jax.experimental import pallas as pl
from jax.experimental.pallas import tpu as pltpu


# --------------------------------------------------------------------------
# Kernel 1: global average pool over the flattened spatial axis.
# --------------------------------------------------------------------------
def _pool_kernel(x_ref, o_ref, *, inv_s):
    # x_ref: (1, C, tS)  one spatial tile of one batch element (C on sublanes,
    #                     spatial on lanes -> dense vregs regardless of C).
    # o_ref: (1, C, 1)   per-channel sums, VMEM-resident across the S axis.
    j = pl.program_id(1)

    @pl.when(j == 0)
    def _():
        o_ref[...] = jnp.zeros_like(o_ref)

    x = x_ref[0].astype(jnp.float32)                   # (C, tS), f32 accumulation
    o_ref[0] += jnp.sum(x, axis=-1, keepdims=True)     # (C, 1) partial sum

    @pl.when(j == pl.num_programs(1) - 1)
    def _():
        o_ref[...] = o_ref[...] * inv_s                # sum -> mean


# --------------------------------------------------------------------------
# Kernel 2: Conv1d(1, 1, k=3, pad=1, bias=False) along channels + softmax.
# --------------------------------------------------------------------------
def _conv_softmax_kernel(w_ref, m_ref, o_ref, *, c_valid):
    # w_ref: (3,) in SMEM (scalar taps).
    # m_ref/o_ref: (B, Cpad) in VMEM, channels on lanes, zero padded past c_valid.
    m = m_ref[...]                                     # (B, Cpad) f32
    c_pad = m.shape[-1]
    lane = jax.lax.broadcasted_iota(jnp.int32, m.shape, 1)

    # left[i]  = m[i-1] (zero at i == 0), right[i] = m[i+1] (zero at i == C-1).
    left = jnp.where(lane == 0, 0.0, pltpu.roll(m, shift=1, axis=1))
    right = jnp.where(lane == c_valid - 1, 0.0,
                      pltpu.roll(m, shift=c_pad - 1, axis=1))

    y = w_ref[0] * left + w_ref[1] * m + w_ref[2] * right
    y = jnp.where(lane < c_valid, y, -jnp.inf)         # exclude padded channels
    y = y - jnp.max(y, axis=-1, keepdims=True)
    e = jnp.exp(y)
    o_ref[...] = (e / jnp.sum(e, axis=-1, keepdims=True)).astype(o_ref.dtype)


# --------------------------------------------------------------------------
# Wrapper
# --------------------------------------------------------------------------
def _pick_spatial_tile(s, c, itemsize, max_tile_bytes):
    """Largest multiple-of-128 divisor of s whose (c, tile) slab fits the budget."""
    if s < 128:
        return s
    max_lanes = max(128, (max_tile_bytes // max(1, c * itemsize)) // 128 * 128)
    cand = min(s // 128 * 128, max_lanes)
    while cand >= 128:
        if s % cand == 0:
            return cand
        cand -= 128
    # No aligned divisor: fall back to the full (always legal) extent.
    # (Partial-tile masking could handle this without a full-size block.)
    return s


def multi_scale_feature_fusion(inputs, conv_w, *, max_tile_bytes=4 * 1024 * 1024):
    """inputs: (b, c, h, w, d) float; conv_w: (3,) Conv1d(1,1,3,pad=1) weight."""
    b, c, h, w, d = inputs.shape
    s = h * w * d
    # Contiguous trailing-dim merge: no transpose, no HBM copy, no dtype cast.
    x = inputs.reshape(b, c, s)

    ts = _pick_spatial_tile(s, c, x.dtype.itemsize, max_tile_bytes)
    num_s_tiles = s // ts

    # ---- Kernel 1: global average pool (bandwidth-bound bulk of the work) ----
    means = pl.pallas_call(
        functools.partial(_pool_kernel, inv_s=1.0 / float(s)),
        out_shape=jax.ShapeDtypeStruct((b, c, 1), jnp.float32),
        grid=(b, num_s_tiles),
        in_specs=[pl.BlockSpec((1, c, ts), lambda i, j: (i, 0, j))],
        out_specs=pl.BlockSpec((1, c, 1), lambda i, j: (i, 0, 0)),
        compiler_params=pltpu.CompilerParams(
            dimension_semantics=("parallel", "arbitrary"),
            vmem_limit_bytes=32 * 1024 * 1024,
        ),
    )(x)

    # ---- Kernel 2: 3-tap channel conv + softmax on the tiny (b, C) means ----
    c_pad = -(-c // 128) * 128
    m = jnp.zeros((b, c_pad), jnp.float32).at[:, :c].set(means.reshape(b, c))
    attn = pl.pallas_call(
        functools.partial(_conv_softmax_kernel, c_valid=c),
        out_shape=jax.ShapeDtypeStruct((b, c_pad), jnp.float32),
        in_specs=[
            pl.BlockSpec(memory_space=pltpu.MemorySpace.SMEM),
            pl.BlockSpec(memory_space=pltpu.MemorySpace.VMEM),
        ],
        out_specs=pl.BlockSpec(memory_space=pltpu.MemorySpace.VMEM),
    )(conv_w.astype(jnp.float32), m)

    return attn[:, :c].astype(inputs.dtype).reshape(b, c, 1, 1, 1)


def reference(inputs, conv_w):
    """Pure-JAX reference mirroring the PyTorch forward."""
    b, c, h, w, d = inputs.shape
    m = jnp.mean(inputs.astype(jnp.float32), axis=(2, 3, 4))     # (b, c)
    mp = jnp.pad(m, ((0, 0), (1, 1)))                            # zero pad=1
    y = conv_w[0] * mp[:, :-2] + conv_w[1] * mp[:, 1:-1] + conv_w[2] * mp[:, 2:]
    sm = jax.nn.softmax(y, axis=-1)
    return sm.reshape(b, c, 1, 1, 1)


if __name__ == "__main__":
    key = jax.random.PRNGKey(0)
    k_x, k_w = jax.random.split(key)

    b, c, h, w, d = 2, 4, 8, 8, 8
    x = jax.random.normal(k_x, (b, c, h, w, d), dtype=jnp.float32)

    # Deterministic synthetic Conv1d(1, 1, 3, bias=False) weight
    # (PyTorch default init is U(-1/sqrt(fan_in), 1/sqrt(fan_in)), fan_in = 3).
    bound = 1.0 / (3.0 ** 0.5)
    conv_w = jax.random.uniform(k_w, (3,), jnp.float32, -bound, bound)

    ref = reference(x, conv_w)

    # Multi-tile path: S = 512 split into 4 spatial tiles of 128 lanes each,
    # exercising the accumulate-across-grid-steps pattern.
    out_tiled = jax.block_until_ready(
        multi_scale_feature_fusion(x, conv_w, max_tile_bytes=2048))
    assert out_tiled.shape == (b, c, 1, 1, 1), out_tiled.shape
    assert jnp.allclose(out_tiled, ref, atol=1e-5, rtol=1e-5), (
        "tiled mismatch vs reference:\n%s\n%s" % (out_tiled.ravel(), ref.ravel()))

    # Default tile-size selection (single tile at this small demo shape).
    out = jax.block_until_ready(multi_scale_feature_fusion(x, conv_w))
    assert jnp.allclose(out, ref, atol=1e-5, rtol=1e-5), (
        "mismatch vs reference:\n%s\n%s" % (out.ravel(), ref.ravel()))

    print("KERNEL_OK")
</pallas_src>

<mosaic_0001>
module attributes {stable_mosaic.version = 11 : i64} {
  func.func @_pool_kernel(%arg0: i32, %arg1: i32, %arg2: memref<1x4x128xf32, #tpu.memory_space<vmem>>, %arg3: memref<1x4x1xf32, #tpu.memory_space<vmem>>) attributes {dimension_semantics = [#tpu.dimension_semantics<parallel>, #tpu.dimension_semantics<arbitrary>], iteration_bounds = array<i64: 2, 4>, scalar_prefetch = 0 : i64, scratch_operands = 0 : i64, tpu.core_type = #tpu.core_type<tc>, window_params = [{transform_indices = @transform_0, window_bounds = array<i64: 1, 4, 128>}, {transform_indices = @transform_1, window_bounds = array<i64: 1, 4, 1>}]} {
    %c0_i32 = arith.constant 0 : i32
    %0 = arith.cmpi eq, %arg1, %c0_i32 : i32
    %1 = arith.extui %0 : i1 to i32
    %c0_i32_0 = arith.constant 0 : i32
    %2 = arith.cmpi ne, %1, %c0_i32_0 : i32
    scf.if %2 {
      %cst_10 = arith.constant 0.000000e+00 : f32
      %16 = vector.broadcast %cst_10 : f32 to vector<1x4x1xf32>
      %c0_11 = arith.constant 0 : index
      %c0_12 = arith.constant 0 : index
      %c0_13 = arith.constant 0 : index
      %17 = vector.load %arg3[%c0_11, %c0_12, %c0_13] : memref<1x4x1xf32, #tpu.memory_space<vmem>>, vector<1x4x1xf32>
      tpu.vector_store %arg3[%c0_11, %c0_12, %c0_13], %16 {strides = array<i32>} : memref<1x4x1xf32, #tpu.memory_space<vmem>>, vector<1x4x1xf32>,
    } else {
    }
    %c0 = arith.constant 0 : index
    %c0_1 = arith.constant 0 : index
    %c0_2 = arith.constant 0 : index
    %3 = vector.load %arg2[%c0, %c0_1, %c0_2] : memref<1x4x128xf32, #tpu.memory_space<vmem>>, vector<1x4x128xf32>
    %4 = vector.shape_cast %3 : vector<1x4x128xf32> to vector<4x128xf32>
    %c0_3 = arith.constant 0 : index
    %c0_4 = arith.constant 0 : index
    %c0_5 = arith.constant 0 : index
    %5 = vector.load %arg3[%c0_3, %c0_4, %c0_5] : memref<1x4x1xf32, #tpu.memory_space<vmem>>, vector<1x4x1xf32>
    %6 = vector.shape_cast %5 : vector<1x4x1xf32> to vector<4x1xf32>
    %cst = arith.constant dense<0.000000e+00> : vector<4xf32>
    %7 = vector.multi_reduction <add>, %4, %cst [1] : vector<4x128xf32> to vector<4xf32>
    %8 = vector.shape_cast %7 : vector<4xf32> to vector<4x1xf32>
    %9 = arith.addf %6, %8 : vector<4x1xf32>
    %c0_6 = arith.constant 0 : index
    %c0_7 = arith.constant 0 : index
    %c0_8 = arith.constant 0 : index
    %10 = vector.load %arg3[%c0_6, %c0_7, %c0_8] : memref<1x4x1xf32, #tpu.memory_space<vmem>>, vector<1x4x1xf32>
    %11 = vector.shape_cast %10 : vector<1x4x1xf32> to vector<4x1xf32>
    %12 = vector.shape_cast %9 : vector<4x1xf32> to vector<1x4x1xf32>
    tpu.vector_store %arg3[%c0_6, %c0_7, %c0_8], %12 {strides = array<i32>} : memref<1x4x1xf32, #tpu.memory_space<vmem>>, vector<1x4x1xf32>,
    %c3_i32 = arith.constant 3 : i32
    %13 = arith.cmpi eq, %arg1, %c3_i32 : i32
    %14 = arith.extui %13 : i1 to i32
    %c0_i32_9 = arith.constant 0 : i32
    %15 = arith.cmpi ne, %14, %c0_i32_9 : i32
    scf.if %15 {
      %c0_10 = arith.constant 0 : index
      %c0_11 = arith.constant 0 : index
      %c0_12 = arith.constant 0 : index
      %16 = vector.load %arg3[%c0_10, %c0_11, %c0_12] : memref<1x4x1xf32, #tpu.memory_space<vmem>>, vector<1x4x1xf32>
      %cst_13 = arith.constant 0.001953125 : f32
      %17 = vector.broadcast %cst_13 : f32 to vector<1x4x1xf32>
      %18 = arith.mulf %16, %17 : vector<1x4x1xf32>
      %c0_14 = arith.constant 0 : index
      %c0_15 = arith.constant 0 : index
      %c0_16 = arith.constant 0 : index
      %19 = vector.load %arg3[%c0_14, %c0_15, %c0_16] : memref<1x4x1xf32, #tpu.memory_space<vmem>>, vector<1x4x1xf32>
      tpu.vector_store %arg3[%c0_14, %c0_15, %c0_16], %18 {strides = array<i32>} : memref<1x4x1xf32, #tpu.memory_space<vmem>>, vector<1x4x1xf32>,
    } else {
    }
    return
  }
  func.func @transform_0(%arg0: i32, %arg1: i32) -> (i32, i32, i32) {
    %c0_i32 = arith.constant 0 : i32
    %c0_i32_0 = arith.constant 0 : i32
    return %arg0, %c0_i32, %arg1 : i32, i32, i32
  }
  func.func @transform_1(%arg0: i32, %arg1: i32) -> (i32, i32, i32) {
    %c0_i32 = arith.constant 0 : i32
    %c0_i32_0 = arith.constant 0 : i32
    %c0_i32_1 = arith.constant 0 : i32
    return %arg0, %c0_i32, %c0_i32_0 : i32, i32, i32
  }
}

</mosaic_0001>

<bundles_post_ra>
// kernel: tpu_custom_call.1
= control target key start
LH: loop header
LB: loop body
LE: loop exit
PB: predicated region body
PF: predicated region fallthrough
CT: control target
= control target key end

     0   :  { %6 = vsyncpa [#allocation3], 0  ;;  %s596_s0 = inlined_call_operand.hbm [shape: f32[2,4,512], index: 0, kind: input, shape index: {}]   ;;  %s597_s1 = inlined_call_operand.vmem [shape: f32[2,4,1], index: 1, kind: output, shape index: {}]  }
   0x1   :  { %8 = vsyncpa [#allocation3 + $0x1], 0  ;;  %s444_s6 = smov 0   ;;  %s446_s7 = smov 0  }
   0x2   :  { %s448_s8 = smov 0   ;;  %s450_s9 = smov 0  }
   0x3   :  { %s452_s10 = smov 0   ;;  %s454_s11 = smov 0  }
   0x4   :  { %s456_s12 = smov 0   ;;  %s458_s13 = smov 0  }
   0x5 LB: > { %s248_s14 = sadd.s32 4294967295, %s430_s13   ;;  %s23_s15 = sadd.s32 1, %s422_s11  ;;  %s430_s13 = sphi %s458_s13, %s14_s13   ;;  %s426_s12 = sphi %s456_s12, %s609_s12   ;;  %s422_s11 = sphi %s454_s11, %s608_s11   ;;  %s418_s10 = sphi %s452_s10, %s607_s10   ;;  %s414_s9 = sphi %s450_s9, %s606_s9   ;;  %s410_s8 = sphi %s448_s8, %s605_s8   ;;  %s406_s7 = sphi %s446_s7, %s604_s7   ;;  %s402_s6 = sphi %s444_s6, %s603_s6  }
   0x6   : > { %p24_p0 = scmp.ge.s32.totalorder %s23_s15, 4  ;;  %s26_s16 = sadd.s32 1, %s426_s12 }
   0x7   : > { %s35_s17 = sadd.s32 1, %s410_s8  ;;  %p42_p1 = scmp.ne.s32.totalorder %s410_s8, %s406_s7 }
   0x8   : > { %s611_s15 = smov (%p24_p0, %s23_s15), 0  ;;  %s613_s16 = smov (!%p24_p0, %s26_s16), %s426_s12 }
   0x9   : > { %s31_s18 = ssub.s32 %s422_s11, %s611_s15  ;;  %p43_p2 = scmp.eq.s32.totalorder %s430_s13, 0 }
   0xa   : > { %p28_p3 = scmp.ge.s32.totalorder %s613_s16, 2  ;;  %p48_p4 = scmp.ne.s32.totalorder %s406_s7, %s402_s6 }
   0xb   : > { %p495_p5 = por %p43_p2, %p42_p1  ;;  %p49_p6 = scmp.eq.s32.totalorder %s248_s14, 0 }
   0xc   : > { %s615_s16 = smov (%p28_p3, %s613_s16), 0  ;;  %p268_p8 = scmp.lt.s32.totalorder %s430_s13, 8 }
   0xd   : > { %p501_p7 = por %p49_p6, %p48_p4  ;;  %s30_s21 = ssub.s32 %s426_s12, %s615_s16 }
   0xe   : > { %s32_s22 = sor.u32 %s31_s18, %s30_s21  ;;  %s98_s23 = sand.u32 1, %s410_s8  }
   0xf   : > { %p33_p9 = scmp.eq.s32.totalorder %s32_s22, 0  ;;  %s252_s24 = sshll.u32 %s98_s23, 2 }
  0x10   : > { %s253_s25 = sshll.u32 %s426_s12, 2  ;;  %s102_s29 = scalar_lea.vmem [#allocation2], %s252_s24 }
  0x11   : > { %s511_s26 = scalar_select %p33_p9, %s410_s8, %s35_s17  }
  0x12   : > { %s107_s27 = sadd.s32 %s422_s11, %s253_s25  ;;  %s111_s30 = sshll.u32 %s102_s29, 4  ;;  %s519_s30 = int_to_ptr.vmem [resolvable:$true] %s111_s30 }
  0x13   : > { %s254_s28 = sshll.u32 %s107_s27, 6  ;;  %p525_p10 = pnand %p268_p8, %p495_p5 }
  0x14   : > { %s517_s4 = scalar_lea.hbm %s596_s0, %s254_s28  ;;  %s99_s6 = scalar_lea.sflag [#allocation3], %s98_s23 }
  0x15   : > { %s334_s14 = scalar_lea.hbm %s517_s4, 64  ;;  %p336_p0 = pneg %p525_p10 }
  0x16   : > { %p335_p13 = scmp.ne.s32.totalorder %s517_s4, %s334_s14  ;;  %s339_s19 = scalar_lea.hbm %s596_s0, 512 }
  0x17   : > { %p340_p3 = scmp.lt.u32.totalorder %s517_s4, %s596_s0  ;;  %p341_p4 = scmp.lt.u32.totalorder %s339_s19, %s334_s14 }
  0x18   : > { %p337_p1 = pnand %p336_p0, %p335_p13  ;;  %p343_p6 = scmp.lt.u32.totalorder %s334_s14, %s517_s4 }
  0x19   : > { %p342_p5 = por %p341_p4, %p340_p3 }
  0x1a   : > { %p338_p2 = pneg %p337_p1 }
  0x1b   : > { %p344_p8 = por %p343_p6, %p342_p5 }
  0x1d   : > { %p345_p9 = pnand %p344_p8, %p338_p2 }
  0x1f   : > { %348 = shalt.err (!%p345_p9)
}
  0x20   : > { %s349_s23 = scalar_lea.vmem %s519_s30, 64  ;;  %s432_s24 = smov [#allocation2]  }
  0x21   : > { %p350_p13 = scmp.ne.s32.totalorder %s519_s30, %s349_s23  ;;  %s354_s25 = sshll.u32 %s432_s24, 4  ;;  %s355_s25 = int_to_ptr.vmem [resolvable:$false] %s354_s25 }
  0x22   : > { %s356_s27 = scalar_lea.vmem %s355_s25, 128  ;;  %p357_p12 = scmp.lt.s32.totalorder %s519_s30, %s355_s25 }
  0x23   : > { %p352_p1 = pnand %p350_p13, %p336_p0  ;;  %p358_p3 = scmp.lt.s32.totalorder %s356_s27, %s349_s23 }
  0x25   : > { %p353_p11 = pneg %p352_p1  ;;  %p359_p4 = por %p358_p3, %p357_p12 }
  0x27   : > { %p360_p5 = pnand %p359_p4, %p353_p11 }
  0x29   : > { %363 = shalt.err (!%p360_p5)
}
  0x2a   : > { %267 = dma.hbm_to_vmem [thread:$0]  (!%p525_p10), %s517_s4, 64, %s519_s30, %s99_s6  }
  0x2b   : > { %p601_p2 = scmp.lt.s32.totalorder %s430_s13, 9  ;;  %p602_p6 = scmp.ge.s32.totalorder %s430_s13, 1 }
  0x2d   : > { %p117_p0 = pnand %p602_p6, %p601_p2 }
  0x2e   : > { %s122_s28 = sand.u32 (!%p117_p0), 1, %s406_s7  }
  0x2f   : > { %120 = sbr.rel (%p117_p0) target bundleno = 221 (0xdd), region = 24  ;;  %s256_s29 = sshll.u32 (!%p117_p0), %s122_s28, 2 }
  0x30   : > { %s123_s2 = scalar_lea.sflag (!%p117_p0), [#allocation3], %s122_s28  ;;  %s126_s3 = scalar_lea.vmem (!%p117_p0), [#allocation2], %s256_s29 }
  0x36   : > { %397 = dma.done.wait (%p501_p7), %s123_s2, 64  }
  0x37   : > { %399 = vsyncadd (%p501_p7), %s123_s2, 4294967232  ;;  %p144_p11 = scmp.lt.s32.totalorder %s418_s10, 1  ;;  %p258_p10 = scmp.ne.s32.totalorder %s414_s9, 0 }
  0x38   : > { %vm152_vm0 = vcmask (!%p258_p10), 3072   ;;  %v433_v0 = vmov (!%p258_p10), 0.0  }
  0x39   : > { %s617_s10 = smov (!%p144_p11, %s418_s10), 1  ;;  %151 = sbr.rel (%p258_p10) target bundleno = 64 (0x40), region = 32 }
  0x3a   : > { %s257_s30 = sshll.u32 %s617_s10, 2 }
  0x3b   : > { %s147_s6 = scalar_lea.vmem %s597_s1, %s257_s30 }
  0x3c   : > { %153 = vst.msk [vmem:[%s147_s6] sm:$0xf] (!%p258_p10), %vm152_vm0, %v433_v0 }
  0x40 PF: > { %v154_v1 = vld [vmem:[%s126_s3] sm:$0xf]  ;;  %vm156_vm1 = vcmask 1043456   ;;  %vm161_vm2 = vcmask 3072   ;;  %p259_p7 = scmp.ne.s32.totalorder %s414_s9, 3 }
  0x41   : > { %v157_v2 = vsel %vm156_vm1, %v154_v1, 0.0 }
  0x42   : > { %158 = vadd.xlane.f32.xlu0 %v157_v2 }
  0x43   : > { %v155_v3 = vld [vmem:[%s147_s6] sm:$0xf] }
  0xcc   : > { %166 = sbr.rel (%p259_p7) target bundleno = 221 (0xdd), region = 36 }
  0xcf   : > { %v159_v4 = vpop.xlane.xlu0 %158 }
  0xd0   : > { %v160_v5 = vadd.f32 %v159_v4, %v155_v3 }
  0xd2   : > { %162 = vst.msk [vmem:[%s147_s6] sm:$0xf] %vm161_vm2, %v160_v5 }
  0xd9   : > { %v167_v6 = vld [vmem:[%s147_s6] sm:$0xf] }
  0xda   : > { %v168_v7 = vmul.f32 0.001953125, %v167_v6 }
  0xdc   : > { %169 = vst.msk [vmem:[%s147_s6] sm:$0xf] %vm161_vm2, %v168_v7 }
  0xdd PF: > { %s14_s13 = sadd.s32 1, %s430_s13   ;;  %s603_s6 = smov %s406_s7 }
  0xde   : > { %p11_p12 = scmp.ge.s32.totalorder %s14_s13, 10   ;;  %s604_s7 = smov %s410_s8 }
  0xdf   : > { %s605_s8 = smov %s511_s26  ;;  %s606_s9 = smov %s422_s11 }
  0xe0   : > { %s607_s10 = smov %s426_s12  ;;  %s608_s11 = smov %s611_s15 }
  0xe1   : > { %s609_s12 = smov %s615_s16  ;;  %13 = sbr.rel (!%p11_p12) target bundleno = 5 (0x5), region = 72 }
  0xe8   :  { %189 = vsyncpa [#allocation3], 1 }
  0xe9   :  { %191 = vsyncpa [#allocation3 + $0x1], 1 }

</bundles_post_ra>
